<compile_context>
chip_gen: v6e
topology: v6e:2x2x1
jax: 0.10.0
libtpu: 0.0.40
codegen_flags: <defaults>
</compile_context>

<pallas_src>
import functools
import math

import jax
import jax.numpy as jnp
from jax import lax
from jax.experimental import pallas as pl
from jax.experimental.pallas import tpu as pltpu

_MB = 1 << 20


def _self_attention_kernel(x_ref, wa_ref, wp_ref, o_ref, y_ref, *,
                           n_head, is_causal, compute_dtype, approx_recip,
                           unroll_heads):
    """One grid step: causal MHA over a (block_b, T, C) slab of the batch."""
    block_b, T, C = x_ref.shape
    hd = C // n_head

    # Fold batch into the matmul M dim; cast once to the compute dtype so all
    # MXU calls run with narrow (bf16) operands + f32 accumulation.
    x2 = x_ref[...].reshape(block_b * T, C).astype(compute_dtype)
    wa = wa_ref[...]
    if wa.dtype != compute_dtype:
        wa = wa.astype(compute_dtype)
    wp = wp_ref[...]
    if wp.dtype != compute_dtype:
        wp = wp.astype(compute_dtype)

    # QKV projection: single wide matmul; cast the f32 accumulator straight to
    # the compute dtype (only one qkv copy kept live).
    qkv = jnp.dot(x2, wa, preferred_element_type=jnp.float32)
    qkv = qkv.astype(compute_dtype).reshape(block_b, T, 3 * C)
    q = qkv[:, :, 0 * C:1 * C]          # 1/sqrt(hd) already folded into W_q
    k = qkv[:, :, 1 * C:2 * C]
    v = qkv[:, :, 2 * C:3 * C]

    # Additive causal bias computed ONCE (2-D, f32) and broadcast over batch:
    # one add per head instead of iota + compare + select per head.
    if is_causal:
        row = lax.broadcasted_iota(jnp.int32, (T, T), 0)
        col = lax.broadcasted_iota(jnp.int32, (T, T), 1)
        attn_bias = jnp.where(row >= col, jnp.float32(0.0), jnp.float32(-1e30))
    else:
        attn_bias = None

    def _attend(qh, kh, vh):
        # Q @ K^T contracting last dims (no explicit transpose); f32 scores.
        s = jnp.einsum('btd,bsd->bts', qh, kh,
                       preferred_element_type=jnp.float32)
        if attn_bias is not None:
            s = s + attn_bias                                 # broadcast over batch
        # Numerically-stable softmax; mask/max/exp/sum stay in f32.
        m = jnp.max(s, axis=-1, keepdims=True)
        p = jnp.exp(s - m)
        denom = jnp.sum(p, axis=-1, keepdims=True)
        inv = pl.reciprocal(denom, approx=approx_recip)       # EUP; deferred norm
        yh = jnp.einsum('bts,bsd->btd', p.astype(compute_dtype), vh,
                        preferred_element_type=jnp.float32)
        return (yh * inv).astype(compute_dtype)

    if unroll_heads:
        # Tiny T: static unroll is cheapest.
        for h in range(n_head):
            sl = slice(h * hd, (h + 1) * hd)
            y_ref[:, :, sl] = _attend(q[:, :, sl], k[:, :, sl], v[:, :, sl])
    else:
        # Larger T: fori_loop bounds live ranges to a single head's (T, T)
        # working set (a static Python unroll lets several heads' f32
        # score/prob temporaries stay live at once and spill VMEM).
        def head_body(h, carry):
            off = pl.multiple_of(h * hd, hd)
            qh = lax.dynamic_slice_in_dim(q, off, hd, axis=2)
            kh = lax.dynamic_slice_in_dim(k, off, hd, axis=2)
            vh = lax.dynamic_slice_in_dim(v, off, hd, axis=2)
            y_ref[:, :, pl.ds(off, hd)] = _attend(qh, kh, vh)
            return carry

        lax.fori_loop(0, n_head, head_body, 0)

    # Output projection: one wide K=C matmul straight out of the y scratch.
    y2 = y_ref[...].reshape(block_b * T, C)
    out = jnp.dot(y2, wp, preferred_element_type=jnp.float32)
    o_ref[...] = out.reshape(block_b, T, C).astype(o_ref.dtype)


def _tpu_vmem_capacity_bytes():
    try:
        return int(pltpu.get_tpu_info().vmem_capacity_bytes)
    except Exception:
        return 64 * _MB      # conservative fallback: v7x per-TensorCore capacity


def _per_step_vmem_bytes(block_b, T, C, *, in_itemsize, out_itemsize,
                         compute_itemsize, weight_bytes):
    """Rough per-grid-step VMEM footprint used to size block_b."""
    act = block_b * T * C
    est = 0
    est += 2 * act * in_itemsize        # x block (double-buffered)
    est += 2 * act * out_itemsize       # out block (double-buffered)
    est += act * compute_itemsize       # per-head output scratch
    est += 3 * act * 4                  # f32 qkv matmul accumulator
    est += 3 * act * compute_itemsize   # q / k / v in compute dtype
    est += 3 * block_b * T * T * 4      # one head's f32 score/prob temporaries
    est += T * T * 4                    # additive causal bias
    est += 2 * weight_bytes             # W_attn^T + W_proj^T (double-buffered)
    return est


def _pick_block_b(B, T, C, budget_bytes, **itemsizes):
    # Prefer grid_b >= min(4, B): >=4 steps lets Pallas double-buffer the
    # x/out slabs behind compute, and a >=2-way "parallel" axis keeps both
    # TensorCores busy on v7x.  Among those, pick the largest block_b whose
    # per-step working set fits the VMEM budget.
    min_grid = min(4, B)
    for bb in sorted((d for d in range(1, B + 1) if B % d == 0), reverse=True):
        if B // bb < min_grid:
            continue
        if _per_step_vmem_bytes(bb, T, C, **itemsizes) <= budget_bytes:
            return bb
    return 1


def prepare_self_attention_weights(w_attn, w_proj, *, n_head, dtype=None):
    """One-time weight prep: transpose, fold 1/sqrt(head_dim) into W_q, cast.

    Call this ONCE at parameter-init time (not inside the per-step call path)
    so the transposed/scaled copies are not re-materialized in HBM every call.
    w_attn: (3C, C), w_proj: (C, C) in nn.Linear convention.
    """
    three_c, C = w_attn.shape
    assert three_c == 3 * C and w_proj.shape == (C, C)
    assert C % n_head == 0
    hd = C // n_head
    wa_t = jnp.swapaxes(w_attn, 0, 1)                          # (C, 3C) = W_attn^T
    scale = jnp.asarray(1.0 / math.sqrt(hd), wa_t.dtype)
    wa_t = jnp.concatenate([wa_t[:, :C] * scale, wa_t[:, C:]], axis=1)
    wp_t = jnp.swapaxes(w_proj, 0, 1)                          # (C, C)  = W_proj^T
    if dtype is not None:
        wa_t = wa_t.astype(dtype)
        wp_t = wp_t.astype(dtype)
    return wa_t, wp_t


def self_attention(x, wa_t, wp_t, *, n_head, is_causal=True, block_b=None,
                   compute_dtype=None, unroll_heads=None):
    """x: (B, T, C); wa_t: (C, 3C); wp_t: (C, C) from prepare_self_attention_weights.

    compute_dtype defaults to the prepared weights' dtype (prepare them in
    bf16 to run all matmuls with bf16 operands + f32 accumulation even when x
    is f32).  Dropout is evaluated in inference mode (identity).
    """
    B, T, C = x.shape
    assert wa_t.shape == (C, 3 * C) and wp_t.shape == (C, C)
    assert C % n_head == 0

    if compute_dtype is None:
        compute_dtype = wa_t.dtype
    compute_dtype = jnp.dtype(compute_dtype)
    approx_recip = compute_dtype == jnp.dtype(jnp.bfloat16)
    if unroll_heads is None:
        unroll_heads = T <= 256

    weight_bytes = (wa_t.size * wa_t.dtype.itemsize
                    + wp_t.size * wp_t.dtype.itemsize)
    itemsizes = dict(in_itemsize=x.dtype.itemsize,
                     out_itemsize=x.dtype.itemsize,
                     compute_itemsize=compute_dtype.itemsize,
                     weight_bytes=weight_bytes)

    vmem_cap = _tpu_vmem_capacity_bytes()
    # ~24-32 MiB working budget on v7x (64 MiB VMEM), ~48-64 MiB on v5e/v6e.
    budget = min(vmem_cap // 2, 64 * _MB)
    if block_b is None:
        block_b = _pick_block_b(B, T, C, budget, **itemsizes)
    assert B % block_b == 0
    grid_b = B // block_b

    est = _per_step_vmem_bytes(block_b, T, C, **itemsizes)
    vmem_limit = int(min(vmem_cap * 3 // 4, max(32 * _MB, est * 5 // 4)))

    kernel = functools.partial(
        _self_attention_kernel, n_head=n_head, is_causal=is_causal,
        compute_dtype=compute_dtype, approx_recip=approx_recip,
        unroll_heads=unroll_heads)

    flops = (2 * B * T * C * 3 * C          # QKV projection
             + 4 * B * T * T * C            # scores + p@v across heads
             + 2 * B * T * C * C)           # output projection
    cost = pl.CostEstimate(
        flops=flops,
        transcendentals=B * n_head * T * T,                 # exp in softmax
        bytes_accessed=2 * x.size * x.dtype.itemsize + weight_bytes)

    return pl.pallas_call(
        kernel,
        out_shape=jax.ShapeDtypeStruct((B, T, C), x.dtype),
        grid_spec=pltpu.PrefetchScalarGridSpec(
            num_scalar_prefetch=0,
            grid=(grid_b,),
            in_specs=[
                pl.BlockSpec((block_b, T, C), lambda b: (b, 0, 0)),   # x slab
                pl.BlockSpec((C, 3 * C), lambda b: (0, 0)),           # W_attn^T
                pl.BlockSpec((C, C), lambda b: (0, 0)),               # W_proj^T
            ],
            out_specs=pl.BlockSpec((block_b, T, C), lambda b: (b, 0, 0)),
            scratch_shapes=[pltpu.VMEM((block_b, T, C), compute_dtype)],
        ),
        compiler_params=pltpu.CompilerParams(
            dimension_semantics=("parallel",),
            vmem_limit_bytes=vmem_limit),
        cost_estimate=cost,
    )(x, wa_t, wp_t)


def _reference(x, w_attn, w_proj, *, n_head, is_causal=True):
    B, T, C = x.shape
    hd = C // n_head
    qkv = jnp.einsum("btc,oc->bto", x, w_attn)
    q, k, v = jnp.split(qkv, 3, axis=-1)
    q = q.reshape(B, T, n_head, hd).transpose(0, 2, 1, 3)
    k = k.reshape(B, T, n_head, hd).transpose(0, 2, 1, 3)
    v = v.reshape(B, T, n_head, hd).transpose(0, 2, 1, 3)
    s = jnp.einsum("bhqd,bhkd->bhqk", q, k) / math.sqrt(hd)
    if is_causal:
        mask = jnp.tril(jnp.ones((T, T), dtype=bool))
        s = jnp.where(mask, s, -1e30)
    p = jax.nn.softmax(s, axis=-1)
    y = jnp.einsum("bhqk,bhkd->bhqd", p, v)
    y = y.transpose(0, 2, 1, 3).reshape(B, T, C)
    return jnp.einsum("btc,oc->bto", y, w_proj)


if __name__ == "__main__":
    # Small config consistent with the module: n_head = 6 (Config default),
    # d_model = 48 -> head_dim = 8, short sequence.  (Real benchmarking should
    # use production shapes, e.g. C=384, T=512 — this is a correctness check.)
    B, T, C, H = 2, 16, 48, 6

    key = jax.random.PRNGKey(0)
    kx, ka, kp = jax.random.split(key, 3)
    x = jax.random.normal(kx, (B, T, C), dtype=jnp.float32)
    # nn.Linear default init scale ~ U(-1/sqrt(fan_in), 1/sqrt(fan_in))
    bound = 1.0 / math.sqrt(C)
    w_attn = jax.random.uniform(ka, (3 * C, C), jnp.float32, -bound, bound)
    w_proj = jax.random.uniform(kp, (C, C), jnp.float32, -bound, bound)

    ref = _reference(x, w_attn, w_proj, n_head=H, is_causal=True)

    # 1) f32 compute path: tight numerics check of the kernel logic.
    wa32, wp32 = prepare_self_attention_weights(w_attn, w_proj, n_head=H,
                                                dtype=jnp.float32)
    out32 = jax.block_until_ready(
        self_attention(x, wa32, wp32, n_head=H, is_causal=True))
    assert out32.shape == (B, T, C)
    assert jnp.allclose(out32, ref, rtol=1e-3, atol=1e-3)

    # 2) Default bf16 compute path (MXU-friendly operands, f32 accumulation /
    #    softmax math).  Looser tolerance accounts for bf16 q/k/v/p rounding.
    wabf, wpbf = prepare_self_attention_weights(w_attn, w_proj, n_head=H,
                                                dtype=jnp.bfloat16)
    outbf = jax.block_until_ready(
        self_attention(x, wabf, wpbf, n_head=H, is_causal=True))
    assert outbf.shape == (B, T, C)
    assert jnp.allclose(outbf.astype(jnp.float32), ref, rtol=3e-2, atol=3e-2)

    print("KERNEL_OK")
</pallas_src>

<mosaic_0001>
module attributes {stable_mosaic.version = 11 : i64} {
  func.func @_self_attention_kernel(%arg0: i32, %arg1: memref<1x16x48xf32, #tpu.memory_space<vmem>>, %arg2: memref<48x144xf32, #tpu.memory_space<vmem>>, %arg3: memref<48x48xf32, #tpu.memory_space<vmem>>, %arg4: memref<1x16x48xf32, #tpu.memory_space<vmem>>, %arg5: memref<1x16x48xf32, #tpu.memory_space<vmem>>) attributes {dimension_semantics = [#tpu.dimension_semantics<parallel>], iteration_bounds = array<i64: 2>, scalar_prefetch = 0 : i64, scratch_operands = 1 : i64, tpu.core_type = #tpu.core_type<tc>, window_params = [{transform_indices = @transform_0, window_bounds = array<i64: 1, 16, 48>}, {pipeline_mode = #tpu.pipeline_mode<synchronous>, transform_indices = @transform_1, window_bounds = array<i64: 48, 144>}, {pipeline_mode = #tpu.pipeline_mode<synchronous>, transform_indices = @transform_2, window_bounds = array<i64: 48, 48>}, {transform_indices = @transform_3, window_bounds = array<i64: 1, 16, 48>}]} {
    %c0 = arith.constant 0 : index
    %c0_0 = arith.constant 0 : index
    %c0_1 = arith.constant 0 : index
    %0 = vector.load %arg1[%c0, %c0_0, %c0_1] : memref<1x16x48xf32, #tpu.memory_space<vmem>>, vector<1x16x48xf32>
    %1 = vector.shape_cast %0 : vector<1x16x48xf32> to vector<16x48xf32>
    %c0_2 = arith.constant 0 : index
    %c0_3 = arith.constant 0 : index
    %2 = vector.load %arg2[%c0_2, %c0_3] : memref<48x144xf32, #tpu.memory_space<vmem>>, vector<48x144xf32>
    %c0_4 = arith.constant 0 : index
    %c0_5 = arith.constant 0 : index
    %3 = vector.load %arg3[%c0_4, %c0_5] : memref<48x48xf32, #tpu.memory_space<vmem>>, vector<48x48xf32>
    %cst = arith.constant dense<0.000000e+00> : vector<16x144xf32>
    %4 = tpu.matmul %1, %2, %cst {dimension_numbers = #tpu.dot_dimension_numbers<[1], [0], [0], [1], [0, 0, 1, 1], [], []>} : vector<16x48xf32>, vector<48x144xf32>, vector<16x144xf32> -> vector<16x144xf32>
    %5 = vector.shape_cast %4 : vector<16x144xf32> to vector<1x16x144xf32>
    %6 = vector.extract_strided_slice %5 {offsets = [0, 0, 0], sizes = [1, 16, 48], strides = [1, 1, 1]} : vector<1x16x144xf32> to vector<1x16x48xf32>
    %7 = vector.extract_strided_slice %5 {offsets = [0, 0, 48], sizes = [1, 16, 48], strides = [1, 1, 1]} : vector<1x16x144xf32> to vector<1x16x48xf32>
    %8 = vector.extract_strided_slice %5 {offsets = [0, 0, 96], sizes = [1, 16, 48], strides = [1, 1, 1]} : vector<1x16x144xf32> to vector<1x16x48xf32>
    %9 = tpu.iota {dimensions = array<i32: 0>} : vector<16x16xi32>
    %10 = tpu.iota {dimensions = array<i32: 1>} : vector<16x16xi32>
    %11 = arith.cmpi sge, %9, %10 : vector<16x16xi32>
    %cst_6 = arith.constant 0.000000e+00 : f32
    %cst_7 = arith.constant -1.000000e+30 : f32
    %12 = vector.broadcast %cst_6 : f32 to vector<16x16xf32>
    %13 = vector.broadcast %cst_7 : f32 to vector<16x16xf32>
    %14 = arith.select %11, %12, %13 : vector<16x16xi1>, vector<16x16xf32>
    %15 = vector.extract_strided_slice %6 {offsets = [0, 0, 0], sizes = [1, 16, 8], strides = [1, 1, 1]} : vector<1x16x48xf32> to vector<1x16x8xf32>
    %16 = vector.extract_strided_slice %7 {offsets = [0, 0, 0], sizes = [1, 16, 8], strides = [1, 1, 1]} : vector<1x16x48xf32> to vector<1x16x8xf32>
    %17 = vector.extract_strided_slice %8 {offsets = [0, 0, 0], sizes = [1, 16, 8], strides = [1, 1, 1]} : vector<1x16x48xf32> to vector<1x16x8xf32>
    "tpu.trace_start"() <{level = 10 : i32, message = "btd,bsd->bts"}> : () -> ()
    %cst_8 = arith.constant dense<0.000000e+00> : vector<1x16x16xf32>
    %18 = tpu.matmul %15, %16, %cst_8 {dimension_numbers = #tpu.dot_dimension_numbers<[2], [2], [1], [1], [0, 0, 0, 1, 1, 1], [0], [0]>} : vector<1x16x8xf32>, vector<1x16x8xf32>, vector<1x16x16xf32> -> vector<1x16x16xf32>
    "tpu.trace_stop"() : () -> ()
    %19 = vector.shape_cast %14 : vector<16x16xf32> to vector<1x16x16xf32>
    %20 = arith.addf %18, %19 : vector<1x16x16xf32>
    %cst_9 = arith.constant dense<0xFF800000> : vector<1x16xf32>
    %21 = vector.multi_reduction <maximumf>, %20, %cst_9 [2] : vector<1x16x16xf32> to vector<1x16xf32>
    %22 = vector.shape_cast %21 : vector<1x16xf32> to vector<1x16x1xf32>
    %23 = vector.broadcast %22 : vector<1x16x1xf32> to vector<1x16x16xf32>
    %24 = arith.subf %20, %23 : vector<1x16x16xf32>
    %25 = math.exp %24 : vector<1x16x16xf32>
    %cst_10 = arith.constant dense<0.000000e+00> : vector<1x16xf32>
    %26 = vector.multi_reduction <add>, %25, %cst_10 [2] : vector<1x16x16xf32> to vector<1x16xf32>
    %27 = vector.shape_cast %26 : vector<1x16xf32> to vector<1x16x1xf32>
    %28 = tpu.reciprocal %27 : vector<1x16x1xf32> -> vector<1x16x1xf32>
    "tpu.trace_start"() <{level = 10 : i32, message = "bts,bsd->btd"}> : () -> ()
    %cst_11 = arith.constant dense<0.000000e+00> : vector<1x16x8xf32>
    %29 = tpu.matmul %25, %17, %cst_11 {dimension_numbers = #tpu.dot_dimension_numbers<[2], [1], [1], [2], [0, 0, 0, 1, 1, 2], [0], [0]>} : vector<1x16x16xf32>, vector<1x16x8xf32>, vector<1x16x8xf32> -> vector<1x16x8xf32>
    "tpu.trace_stop"() : () -> ()
    %30 = vector.broadcast %28 : vector<1x16x1xf32> to vector<1x16x8xf32>
    %31 = arith.mulf %29, %30 : vector<1x16x8xf32>
    %c0_12 = arith.constant 0 : index
    %c0_13 = arith.constant 0 : index
    %c0_14 = arith.constant 0 : index
    %32 = vector.load %arg5[%c0_12, %c0_13, %c0_14] : memref<1x16x48xf32, #tpu.memory_space<vmem>>, vector<1x16x8xf32>
    tpu.vector_store %arg5[%c0_12, %c0_13, %c0_14], %31 {strides = array<i32>} : memref<1x16x48xf32, #tpu.memory_space<vmem>>, vector<1x16x8xf32>,
    %33 = vector.extract_strided_slice %6 {offsets = [0, 0, 8], sizes = [1, 16, 8], strides = [1, 1, 1]} : vector<1x16x48xf32> to vector<1x16x8xf32>
    %34 = vector.extract_strided_slice %7 {offsets = [0, 0, 8], sizes = [1, 16, 8], strides = [1, 1, 1]} : vector<1x16x48xf32> to vector<1x16x8xf32>
    %35 = vector.extract_strided_slice %8 {offsets = [0, 0, 8], sizes = [1, 16, 8], strides = [1, 1, 1]} : vector<1x16x48xf32> to vector<1x16x8xf32>
    "tpu.trace_start"() <{level = 10 : i32, message = "btd,bsd->bts"}> : () -> ()
    %cst_15 = arith.constant dense<0.000000e+00> : vector<1x16x16xf32>
    %36 = tpu.matmul %33, %34, %cst_15 {dimension_numbers = #tpu.dot_dimension_numbers<[2], [2], [1], [1], [0, 0, 0, 1, 1, 1], [0], [0]>} : vector<1x16x8xf32>, vector<1x16x8xf32>, vector<1x16x16xf32> -> vector<1x16x16xf32>
    "tpu.trace_stop"() : () -> ()
    %37 = vector.shape_cast %14 : vector<16x16xf32> to vector<1x16x16xf32>
    %38 = arith.addf %36, %37 : vector<1x16x16xf32>
    %cst_16 = arith.constant dense<0xFF800000> : vector<1x16xf32>
    %39 = vector.multi_reduction <maximumf>, %38, %cst_16 [2] : vector<1x16x16xf32> to vector<1x16xf32>
    %40 = vector.shape_cast %39 : vector<1x16xf32> to vector<1x16x1xf32>
    %41 = vector.broadcast %40 : vector<1x16x1xf32> to vector<1x16x16xf32>
    %42 = arith.subf %38, %41 : vector<1x16x16xf32>
    %43 = math.exp %42 : vector<1x16x16xf32>
    %cst_17 = arith.constant dense<0.000000e+00> : vector<1x16xf32>
    %44 = vector.multi_reduction <add>, %43, %cst_17 [2] : vector<1x16x16xf32> to vector<1x16xf32>
    %45 = vector.shape_cast %44 : vector<1x16xf32> to vector<1x16x1xf32>
    %46 = tpu.reciprocal %45 : vector<1x16x1xf32> -> vector<1x16x1xf32>
    "tpu.trace_start"() <{level = 10 : i32, message = "bts,bsd->btd"}> : () -> ()
    %cst_18 = arith.constant dense<0.000000e+00> : vector<1x16x8xf32>
    %47 = tpu.matmul %43, %35, %cst_18 {dimension_numbers = #tpu.dot_dimension_numbers<[2], [1], [1], [2], [0, 0, 0, 1, 1, 2], [0], [0]>} : vector<1x16x16xf32>, vector<1x16x8xf32>, vector<1x16x8xf32> -> vector<1x16x8xf32>
    "tpu.trace_stop"() : () -> ()
    %48 = vector.broadcast %46 : vector<1x16x1xf32> to vector<1x16x8xf32>
    %49 = arith.mulf %47, %48 : vector<1x16x8xf32>
    %c0_19 = arith.constant 0 : index
    %c0_20 = arith.constant 0 : index
    %c8 = arith.constant 8 : index
    %50 = vector.load %arg5[%c0_19, %c0_20, %c8] : memref<1x16x48xf32, #tpu.memory_space<vmem>>, vector<1x16x8xf32>
    tpu.vector_store %arg5[%c0_19, %c0_20, %c8], %49 {strides = array<i32>} : memref<1x16x48xf32, #tpu.memory_space<vmem>>, vector<1x16x8xf32>,
    %51 = vector.extract_strided_slice %6 {offsets = [0, 0, 16], sizes = [1, 16, 8], strides = [1, 1, 1]} : vector<1x16x48xf32> to vector<1x16x8xf32>
    %52 = vector.extract_strided_slice %7 {offsets = [0, 0, 16], sizes = [1, 16, 8], strides = [1, 1, 1]} : vector<1x16x48xf32> to vector<1x16x8xf32>
    %53 = vector.extract_strided_slice %8 {offsets = [0, 0, 16], sizes = [1, 16, 8], strides = [1, 1, 1]} : vector<1x16x48xf32> to vector<1x16x8xf32>
    "tpu.trace_start"() <{level = 10 : i32, message = "btd,bsd->bts"}> : () -> ()
    %cst_21 = arith.constant dense<0.000000e+00> : vector<1x16x16xf32>
    %54 = tpu.matmul %51, %52, %cst_21 {dimension_numbers = #tpu.dot_dimension_numbers<[2], [2], [1], [1], [0, 0, 0, 1, 1, 1], [0], [0]>} : vector<1x16x8xf32>, vector<1x16x8xf32>, vector<1x16x16xf32> -> vector<1x16x16xf32>
    "tpu.trace_stop"() : () -> ()
    %55 = vector.shape_cast %14 : vector<16x16xf32> to vector<1x16x16xf32>
    %56 = arith.addf %54, %55 : vector<1x16x16xf32>
    %cst_22 = arith.constant dense<0xFF800000> : vector<1x16xf32>
    %57 = vector.multi_reduction <maximumf>, %56, %cst_22 [2] : vector<1x16x16xf32> to vector<1x16xf32>
    %58 = vector.shape_cast %57 : vector<1x16xf32> to vector<1x16x1xf32>
    %59 = vector.broadcast %58 : vector<1x16x1xf32> to vector<1x16x16xf32>
    %60 = arith.subf %56, %59 : vector<1x16x16xf32>
    %61 = math.exp %60 : vector<1x16x16xf32>
    %cst_23 = arith.constant dense<0.000000e+00> : vector<1x16xf32>
    %62 = vector.multi_reduction <add>, %61, %cst_23 [2] : vector<1x16x16xf32> to vector<1x16xf32>
    %63 = vector.shape_cast %62 : vector<1x16xf32> to vector<1x16x1xf32>
    %64 = tpu.reciprocal %63 : vector<1x16x1xf32> -> vector<1x16x1xf32>
    "tpu.trace_start"() <{level = 10 : i32, message = "bts,bsd->btd"}> : () -> ()
    %cst_24 = arith.constant dense<0.000000e+00> : vector<1x16x8xf32>
    %65 = tpu.matmul %61, %53, %cst_24 {dimension_numbers = #tpu.dot_dimension_numbers<[2], [1], [1], [2], [0, 0, 0, 1, 1, 2], [0], [0]>} : vector<1x16x16xf32>, vector<1x16x8xf32>, vector<1x16x8xf32> -> vector<1x16x8xf32>
    "tpu.trace_stop"() : () -> ()
    %66 = vector.broadcast %64 : vector<1x16x1xf32> to vector<1x16x8xf32>
    %67 = arith.mulf %65, %66 : vector<1x16x8xf32>
    %c0_25 = arith.constant 0 : index
    %c0_26 = arith.constant 0 : index
    %c16 = arith.constant 16 : index
    %68 = vector.load %arg5[%c0_25, %c0_26, %c16] : memref<1x16x48xf32, #tpu.memory_space<vmem>>, vector<1x16x8xf32>
    tpu.vector_store %arg5[%c0_25, %c0_26, %c16], %67 {strides = array<i32>} : memref<1x16x48xf32, #tpu.memory_space<vmem>>, vector<1x16x8xf32>,
    %69 = vector.extract_strided_slice %6 {offsets = [0, 0, 24], sizes = [1, 16, 8], strides = [1, 1, 1]} : vector<1x16x48xf32> to vector<1x16x8xf32>
    %70 = vector.extract_strided_slice %7 {offsets = [0, 0, 24], sizes = [1, 16, 8], strides = [1, 1, 1]} : vector<1x16x48xf32> to vector<1x16x8xf32>
    %71 = vector.extract_strided_slice %8 {offsets = [0, 0, 24], sizes = [1, 16, 8], strides = [1, 1, 1]} : vector<1x16x48xf32> to vector<1x16x8xf32>
    "tpu.trace_start"() <{level = 10 : i32, message = "btd,bsd->bts"}> : () -> ()
    %cst_27 = arith.constant dense<0.000000e+00> : vector<1x16x16xf32>
    %72 = tpu.matmul %69, %70, %cst_27 {dimension_numbers = #tpu.dot_dimension_numbers<[2], [2], [1], [1], [0, 0, 0, 1, 1, 1], [0], [0]>} : vector<1x16x8xf32>, vector<1x16x8xf32>, vector<1x16x16xf32> -> vector<1x16x16xf32>
    "tpu.trace_stop"() : () -> ()
    %73 = vector.shape_cast %14 : vector<16x16xf32> to vector<1x16x16xf32>
    %74 = arith.addf %72, %73 : vector<1x16x16xf32>
    %cst_28 = arith.constant dense<0xFF800000> : vector<1x16xf32>
    %75 = vector.multi_reduction <maximumf>, %74, %cst_28 [2] : vector<1x16x16xf32> to vector<1x16xf32>
    %76 = vector.shape_cast %75 : vector<1x16xf32> to vector<1x16x1xf32>
    %77 = vector.broadcast %76 : vector<1x16x1xf32> to vector<1x16x16xf32>
    %78 = arith.subf %74, %77 : vector<1x16x16xf32>
    %79 = math.exp %78 : vector<1x16x16xf32>
    %cst_29 = arith.constant dense<0.000000e+00> : vector<1x16xf32>
    %80 = vector.multi_reduction <add>, %79, %cst_29 [2] : vector<1x16x16xf32> to vector<1x16xf32>
    %81 = vector.shape_cast %80 : vector<1x16xf32> to vector<1x16x1xf32>
    %82 = tpu.reciprocal %81 : vector<1x16x1xf32> -> vector<1x16x1xf32>
    "tpu.trace_start"() <{level = 10 : i32, message = "bts,bsd->btd"}> : () -> ()
    %cst_30 = arith.constant dense<0.000000e+00> : vector<1x16x8xf32>
    %83 = tpu.matmul %79, %71, %cst_30 {dimension_numbers = #tpu.dot_dimension_numbers<[2], [1], [1], [2], [0, 0, 0, 1, 1, 2], [0], [0]>} : vector<1x16x16xf32>, vector<1x16x8xf32>, vector<1x16x8xf32> -> vector<1x16x8xf32>
    "tpu.trace_stop"() : () -> ()
    %84 = vector.broadcast %82 : vector<1x16x1xf32> to vector<1x16x8xf32>
    %85 = arith.mulf %83, %84 : vector<1x16x8xf32>
    %c0_31 = arith.constant 0 : index
    %c0_32 = arith.constant 0 : index
    %c24 = arith.constant 24 : index
    %86 = vector.load %arg5[%c0_31, %c0_32, %c24] : memref<1x16x48xf32, #tpu.memory_space<vmem>>, vector<1x16x8xf32>
    tpu.vector_store %arg5[%c0_31, %c0_32, %c24], %85 {strides = array<i32>} : memref<1x16x48xf32, #tpu.memory_space<vmem>>, vector<1x16x8xf32>,
    %87 = vector.extract_strided_slice %6 {offsets = [0, 0, 32], sizes = [1, 16, 8], strides = [1, 1, 1]} : vector<1x16x48xf32> to vector<1x16x8xf32>
    %88 = vector.extract_strided_slice %7 {offsets = [0, 0, 32], sizes = [1, 16, 8], strides = [1, 1, 1]} : vector<1x16x48xf32> to vector<1x16x8xf32>
    %89 = vector.extract_strided_slice %8 {offsets = [0, 0, 32], sizes = [1, 16, 8], strides = [1, 1, 1]} : vector<1x16x48xf32> to vector<1x16x8xf32>
    "tpu.trace_start"() <{level = 10 : i32, message = "btd,bsd->bts"}> : () -> ()
    %cst_33 = arith.constant dense<0.000000e+00> : vector<1x16x16xf32>
    %90 = tpu.matmul %87, %88, %cst_33 {dimension_numbers = #tpu.dot_dimension_numbers<[2], [2], [1], [1], [0, 0, 0, 1, 1, 1], [0], [0]>} : vector<1x16x8xf32>, vector<1x16x8xf32>, vector<1x16x16xf32> -> vector<1x16x16xf32>
    "tpu.trace_stop"() : () -> ()
    %91 = vector.shape_cast %14 : vector<16x16xf32> to vector<1x16x16xf32>
    %92 = arith.addf %90, %91 : vector<1x16x16xf32>
    %cst_34 = arith.constant dense<0xFF800000> : vector<1x16xf32>
    %93 = vector.multi_reduction <maximumf>, %92, %cst_34 [2] : vector<1x16x16xf32> to vector<1x16xf32>
    %94 = vector.shape_cast %93 : vector<1x16xf32> to vector<1x16x1xf32>
    %95 = vector.broadcast %94 : vector<1x16x1xf32> to vector<1x16x16xf32>
    %96 = arith.subf %92, %95 : vector<1x16x16xf32>
    %97 = math.exp %96 : vector<1x16x16xf32>
    %cst_35 = arith.constant dense<0.000000e+00> : vector<1x16xf32>
    %98 = vector.multi_reduction <add>, %97, %cst_35 [2] : vector<1x16x16xf32> to vector<1x16xf32>
    %99 = vector.shape_cast %98 : vector<1x16xf32> to vector<1x16x1xf32>
    %100 = tpu.reciprocal %99 : vector<1x16x1xf32> -> vector<1x16x1xf32>
    "tpu.trace_start"() <{level = 10 : i32, message = "bts,bsd->btd"}> : () -> ()
    %cst_36 = arith.constant dense<0.000000e+00> : vector<1x16x8xf32>
    %101 = tpu.matmul %97, %89, %cst_36 {dimension_numbers = #tpu.dot_dimension_numbers<[2], [1], [1], [2], [0, 0, 0, 1, 1, 2], [0], [0]>} : vector<1x16x16xf32>, vector<1x16x8xf32>, vector<1x16x8xf32> -> vector<1x16x8xf32>
    "tpu.trace_stop"() : () -> ()
    %102 = vector.broadcast %100 : vector<1x16x1xf32> to vector<1x16x8xf32>
    %103 = arith.mulf %101, %102 : vector<1x16x8xf32>
    %c0_37 = arith.constant 0 : index
    %c0_38 = arith.constant 0 : index
    %c32 = arith.constant 32 : index
    %104 = vector.load %arg5[%c0_37, %c0_38, %c32] : memref<1x16x48xf32, #tpu.memory_space<vmem>>, vector<1x16x8xf32>
    tpu.vector_store %arg5[%c0_37, %c0_38, %c32], %103 {strides = array<i32>} : memref<1x16x48xf32, #tpu.memory_space<vmem>>, vector<1x16x8xf32>,
    %105 = vector.extract_strided_slice %6 {offsets = [0, 0, 40], sizes = [1, 16, 8], strides = [1, 1, 1]} : vector<1x16x48xf32> to vector<1x16x8xf32>
    %106 = vector.extract_strided_slice %7 {offsets = [0, 0, 40], sizes = [1, 16, 8], strides = [1, 1, 1]} : vector<1x16x48xf32> to vector<1x16x8xf32>
    %107 = vector.extract_strided_slice %8 {offsets = [0, 0, 40], sizes = [1, 16, 8], strides = [1, 1, 1]} : vector<1x16x48xf32> to vector<1x16x8xf32>
    "tpu.trace_start"() <{level = 10 : i32, message = "btd,bsd->bts"}> : () -> ()
    %cst_39 = arith.constant dense<0.000000e+00> : vector<1x16x16xf32>
    %108 = tpu.matmul %105, %106, %cst_39 {dimension_numbers = #tpu.dot_dimension_numbers<[2], [2], [1], [1], [0, 0, 0, 1, 1, 1], [0], [0]>} : vector<1x16x8xf32>, vector<1x16x8xf32>, vector<1x16x16xf32> -> vector<1x16x16xf32>
    "tpu.trace_stop"() : () -> ()
    %109 = vector.shape_cast %14 : vector<16x16xf32> to vector<1x16x16xf32>
    %110 = arith.addf %108, %109 : vector<1x16x16xf32>
    %cst_40 = arith.constant dense<0xFF800000> : vector<1x16xf32>
    %111 = vector.multi_reduction <maximumf>, %110, %cst_40 [2] : vector<1x16x16xf32> to vector<1x16xf32>
    %112 = vector.shape_cast %111 : vector<1x16xf32> to vector<1x16x1xf32>
    %113 = vector.broadcast %112 : vector<1x16x1xf32> to vector<1x16x16xf32>
    %114 = arith.subf %110, %113 : vector<1x16x16xf32>
    %115 = math.exp %114 : vector<1x16x16xf32>
    %cst_41 = arith.constant dense<0.000000e+00> : vector<1x16xf32>
    %116 = vector.multi_reduction <add>, %115, %cst_41 [2] : vector<1x16x16xf32> to vector<1x16xf32>
    %117 = vector.shape_cast %116 : vector<1x16xf32> to vector<1x16x1xf32>
    %118 = tpu.reciprocal %117 : vector<1x16x1xf32> -> vector<1x16x1xf32>
    "tpu.trace_start"() <{level = 10 : i32, message = "bts,bsd->btd"}> : () -> ()
    %cst_42 = arith.constant dense<0.000000e+00> : vector<1x16x8xf32>
    %119 = tpu.matmul %115, %107, %cst_42 {dimension_numbers = #tpu.dot_dimension_numbers<[2], [1], [1], [2], [0, 0, 0, 1, 1, 2], [0], [0]>} : vector<1x16x16xf32>, vector<1x16x8xf32>, vector<1x16x8xf32> -> vector<1x16x8xf32>
    "tpu.trace_stop"() : () -> ()
    %120 = vector.broadcast %118 : vector<1x16x1xf32> to vector<1x16x8xf32>
    %121 = arith.mulf %119, %120 : vector<1x16x8xf32>
    %c0_43 = arith.constant 0 : index
    %c0_44 = arith.constant 0 : index
    %c40 = arith.constant 40 : index
    %122 = vector.load %arg5[%c0_43, %c0_44, %c40] : memref<1x16x48xf32, #tpu.memory_space<vmem>>, vector<1x16x8xf32>
    tpu.vector_store %arg5[%c0_43, %c0_44, %c40], %121 {strides = array<i32>} : memref<1x16x48xf32, #tpu.memory_space<vmem>>, vector<1x16x8xf32>,
    %c0_45 = arith.constant 0 : index
    %c0_46 = arith.constant 0 : index
    %c0_47 = arith.constant 0 : index
    %123 = vector.load %arg5[%c0_45, %c0_46, %c0_47] : memref<1x16x48xf32, #tpu.memory_space<vmem>>, vector<1x16x48xf32>
    %124 = vector.shape_cast %123 : vector<1x16x48xf32> to vector<16x48xf32>
    %cst_48 = arith.constant dense<0.000000e+00> : vector<16x48xf32>
    %125 = tpu.matmul %124, %3, %cst_48 {dimension_numbers = #tpu.dot_dimension_numbers<[1], [0], [0], [1], [0, 0, 1, 1], [], []>} : vector<16x48xf32>, vector<48x48xf32>, vector<16x48xf32> -> vector<16x48xf32>
    %126 = vector.shape_cast %125 : vector<16x48xf32> to vector<1x16x48xf32>
    %c0_49 = arith.constant 0 : index
    %c0_50 = arith.constant 0 : index
    %c0_51 = arith.constant 0 : index
    %127 = vector.load %arg4[%c0_49, %c0_50, %c0_51] : memref<1x16x48xf32, #tpu.memory_space<vmem>>, vector<1x16x48xf32>
    tpu.vector_store %arg4[%c0_49, %c0_50, %c0_51], %126 {strides = array<i32>} : memref<1x16x48xf32, #tpu.memory_space<vmem>>, vector<1x16x48xf32>,
    return
  }
  func.func @transform_0(%arg0: i32) -> (i32, i32, i32) {
    %c0_i32 = arith.constant 0 : i32
    %c0_i32_0 = arith.constant 0 : i32
    %c0_i32_1 = arith.constant 0 : i32
    return %arg0, %c0_i32, %c0_i32_0 : i32, i32, i32
  }
  func.func @transform_1(%arg0: i32) -> (i32, i32) {
    %c0_i32 = arith.constant 0 : i32
    %c0_i32_0 = arith.constant 0 : i32
    %c0_i32_1 = arith.constant 0 : i32
    return %c0_i32, %c0_i32_0 : i32, i32
  }
  func.func @transform_2(%arg0: i32) -> (i32, i32) {
    %c0_i32 = arith.constant 0 : i32
    %c0_i32_0 = arith.constant 0 : i32
    %c0_i32_1 = arith.constant 0 : i32
    return %c0_i32, %c0_i32_0 : i32, i32
  }
  func.func @transform_3(%arg0: i32) -> (i32, i32, i32) {
    %c0_i32 = arith.constant 0 : i32
    %c0_i32_0 = arith.constant 0 : i32
    %c0_i32_1 = arith.constant 0 : i32
    return %arg0, %c0_i32, %c0_i32_0 : i32, i32, i32
  }
}

</mosaic_0001>

<bundles_post_ra>
// kernel: tpu_custom_call.1
= control target key start
LH: loop header
LB: loop body
LE: loop exit
PB: predicated region body
PF: predicated region fallthrough
CT: control target
= control target key end

     0   :  { %8 = vsyncpa [#allocation4], 0  ;;  %s2756_s0 = inlined_call_operand.hbm [shape: f32[2,16,48], index: 0, kind: input, shape index: {}]   ;;  %s2757_s1 = inlined_call_operand.hbm [shape: f32[48,144], index: 1, kind: input, shape index: {}]   ;;  %s2758_s2 = inlined_call_operand.hbm [shape: f32[48,48], index: 2, kind: input, shape index: {}]   ;;  %s2759_s3 = inlined_call_operand.hbm [shape: f32[2,16,48], index: 3, kind: output, shape index: {}]  }
   0x1   :  { %10 = vsyncpa [#allocation4 + $0x1], 0 }
   0x2   :  { %11 = vsyncpa [#allocation7], 0 }
   0x3   :  { %12 = vsyncpa [#allocation5], 0 }
   0x4   :  { %14 = vsyncpa [#allocation5 + $0x1], 0  ;;  %s2323_s12 = smov 0   ;;  %s2325_s13 = smov 0  }
   0x5   :  { %s2327_s14 = smov 0   ;;  %s2329_s15 = smov 0  }
   0x6 LB: > { %s2344_s16 = sadd.s32 4294967295, %s2275_s15   ;;  %s1775_s17 = sadd.s32 4294967294, %s2275_s15   ;;  %s2275_s15 = sphi %s2329_s15, %s2781_s15   ;;  %s2271_s14 = sphi %s2327_s14, %s2780_s14   ;;  %s2267_s13 = sphi %s2325_s13, %s2779_s13   ;;  %s2263_s12 = sphi %s2323_s12, %s2778_s12  }
   0x7   : > { %p40_p0 = scmp.ne.s32.totalorder %s2267_s13, %s2263_s12  ;;  %p2760_p1 = scmp.eq.s32.totalorder %s2344_s16, 0 }
   0x8   : > { %p112_p3 = scmp.eq.s32.totalorder %s1775_s17, 1  ;;  %p1776_p5 = scmp.ge.s32.totalorder %s2275_s15, 1 }
   0x9   : > { %p2353_p4 = por %p2760_p1, %p40_p0  ;;  %p119_p7 = scmp.lt.s32.totalorder %s2275_s15, 3 }
   0xa   : > { %p2358_p6 = por %p112_p3, %p40_p0  ;;  %s2277_s21 = smov [#allocation6]  }
   0xb   : > { %s2764_s18 = scalar_select %p2353_p4, 1, 0 }
   0xc   : > { %s2765_s19 = scalar_select %p2358_p6, 1, 0 }
   0xd   : > { %p2363_p8 = pnand %p1776_p5, %p119_p7  ;;  %s131_s22 = sshll.u32 %s2277_s21, 4  ;;  %s132_s22 = int_to_ptr.vmem [resolvable:$true] %s131_s22 }
   0xe   : > { %s2278_s24 = smov [#allocation8]   ;;  %s2138_s26 = scalar_lea.vmem %s132_s22, 1536 }
   0xf   : > { %s2766_s20 = scalar_select %p2363_p8, 1, 0 }
  0x10   : > { %p2002_p9 = pneg %p2363_p8  ;;  %s144_s25 = sshll.u32 %s2278_s24, 4  ;;  %s145_s25 = int_to_ptr.vmem [resolvable:$true] %s144_s25 }
  0x11   : > { %p2139_p13 = scmp.ne.s32.totalorder %s132_s22, %s2138_s26  ;;  %p2146_p5 = scmp.lt.s32.totalorder %s132_s22, %s132_s22 }
  0x12   : > { %p2372_p11 = pnand %p2002_p9, %p2760_p1  ;;  %p2147_p7 = scmp.lt.s32.totalorder %s2138_s26, %s2138_s26 }
  0x14   : > { %p2129_p12 = pneg %p2372_p11  ;;  %p2148_p10 = por %p2147_p7, %p2146_p5 }
  0x16   : > { %p2141_p0 = pnand %p2139_p13, %p2129_p12 }
  0x18   : > { %p2142_p3 = pneg %p2141_p0 }
  0x1a   : > { %p2149_p9 = pnand %p2148_p10, %p2142_p3 }
  0x1c   : > { %2152 = shalt.err (!%p2149_p9)
}
  0x1d   : > { %s2279_s27 = smov 256   ;;  %s2280_s28 = smov 16  }
  0x1e   : > { %2005 = dma.hbm_to_vmem [thread:$0]  (!%p2372_p11), %s2757_s1, 1536, %s132_s22, [#allocation7], %s2279_s27, %s2279_s27, %s2280_s28  }
  0x1f   : > { %s2164_s4 = scalar_lea.vmem %s145_s25, 768  ;;  %p2172_p2 = scmp.lt.s32.totalorder %s145_s25, %s145_s25 }
  0x20   : > { %p2165_p1 = scmp.ne.s32.totalorder %s145_s25, %s2164_s4  ;;  %p2173_p6 = scmp.lt.s32.totalorder %s2164_s4, %s2164_s4 }
  0x22   : > { %p2167_p13 = pnand %p2165_p1, %p2129_p12  ;;  %p2174_p5 = por %p2173_p6, %p2172_p2 }
  0x24   : > { %p2168_p0 = pneg %p2167_p13 }
  0x26   : > { %p2175_p10 = pnand %p2174_p5, %p2168_p0 }
  0x28   : > { %2178 = shalt.err (!%p2175_p10)
}
  0x29   : > { %s2281_s5 = smov 128   ;;  %s2282_s6 = smov 8  }
  0x2a   : > { %2008 = dma.hbm_to_vmem [thread:$0]  (!%p2372_p11), %s2758_s2, 768, %s145_s25, [#allocation7], %s2281_s5, %s2281_s5, %s2282_s6  }
  0x2b   : > { %s2398_s9 = sadd.s32 1, %s2275_s15   ;;  %s27_s11 = sadd.s32 1, %s2271_s14 }
  0x2c   : > { %s24_s10 = ssub.s32 %s2275_s15, %s2398_s9  ;;  %p34_p2 = scmp.ne.s32.totalorder %s2271_s14, %s2267_s13 }
  0x2d   : > { %p25_p1 = scmp.eq.s32.totalorder %s24_s10, 0  ;;  %p35_p6 = scmp.eq.s32.totalorder %s2275_s15, 0 }
  0x2e   : > { %p2768_p3 = scmp.eq.s32.totalorder %s2344_s16, 1  ;;  %p2019_p9 = scmp.lt.s32.totalorder %s2275_s15, 2 }
  0x2f   : > { %s2407_s17 = scalar_select %p25_p1, %s2271_s14, %s27_s11  }
  0x30   : > { %p36_p12 = por %p35_p6, %p34_p2  ;;  %p2411_p7 = por %p2768_p3, %p34_p2 }
  0x31   : > { %s158_s22 = sand.u32 1, %s2271_s14   ;;  %s1833_s24 = sshll.u32 %s2275_s15, 8 }
  0x32   : > { %s2769_s21 = scalar_select %p2411_p7, 1, 0 }
  0x33   : > { %s1780_s23 = sshll.u32 %s158_s22, 4  ;;  %s2421_s27 = scalar_lea.hbm %s2756_s0, %s1833_s24 }
  0x34   : > { %s162_s28 = scalar_lea.vmem [#allocation3], %s1780_s23  ;;  %p2425_p11 = pnand %p2019_p9, %p36_p12 }
  0x35   : > { %s169_s29 = sshll.u32 %s162_s28, 4  ;;  %s2429_s4 = scalar_lea.sflag [#allocation4], %s158_s22  ;;  %s2423_s29 = int_to_ptr.vmem [resolvable:$true] %s169_s29 }
  0x36   : > { %s2179_s7 = scalar_lea.hbm %s2421_s27, 256  ;;  %p2181_p0 = pneg %p2425_p11 }
  0x37   : > { %p2180_p13 = scmp.ne.s32.totalorder %s2421_s27, %s2179_s7  ;;  %s2184_s11 = scalar_lea.hbm %s2756_s0, 512 }
  0x38   : > { %p2185_p1 = scmp.lt.s32.totalorder %s2421_s27, %s2756_s0  ;;  %p2186_p2 = scmp.lt.s32.totalorder %s2184_s11, %s2179_s7 }
  0x39   : > { %p2182_p5 = pnand %p2181_p0, %p2180_p13 }
  0x3a   : > { %p2187_p6 = por %p2186_p2, %p2185_p1 }
  0x3b   : > { %p2183_p10 = pneg %p2182_p5 }
  0x3d   : > { %p2188_p12 = pnand %p2187_p6, %p2183_p10 }
  0x3f   : > { %2191 = shalt.err (!%p2188_p12)
}
  0x40   : > { %s2192_s22 = scalar_lea.vmem %s2423_s29, 256  ;;  %s2283_s25 = smov [#allocation3]  }
  0x41   : > { %p2193_p3 = scmp.ne.s32.totalorder %s2423_s29, %s2192_s22  ;;  %s2197_s26 = sshll.u32 %s2283_s25, 4  ;;  %s2198_s26 = int_to_ptr.vmem [resolvable:$false] %s2197_s26 }
  0x42   : > { %s2199_s28 = scalar_lea.vmem %s2198_s26, 512  ;;  %p2200_p5 = scmp.lt.s32.totalorder %s2423_s29, %s2198_s26 }
  0x43   : > { %p2195_p9 = pnand %p2193_p3, %p2181_p0  ;;  %p2201_p7 = scmp.lt.s32.totalorder %s2199_s28, %s2192_s22 }
  0x45   : > { %p2196_p13 = pneg %p2195_p9  ;;  %p2202_p4 = por %p2201_p7, %p2200_p5 }
  0x47   : > { %p2203_p8 = pnand %p2202_p4, %p2196_p13 }
  0x49   : > { %2206 = shalt.err (!%p2203_p8)
}
  0x4a   : > { %2012 = dma.hbm_to_vmem [thread:$0]  (!%p2425_p11), %s2421_s27, 256, %s2423_s29, %s2429_s4, %s2281_s5, %s2281_s5, %s2282_s6  }
  0x4b   : > { %p2771_p0 = scmp.ne.s32.totalorder %s2766_s20, 0 }
  0x4c   : > { %s2456_s7 = sand.u32 (!%p2771_p0), 1, %s2267_s13   ;;  %p2772_p4 = scmp.ne.s32.totalorder (!%p2771_p0), %s2764_s18, 0 }
  0x4d   : > { %181 = sbr.rel (%p2771_p0) target bundleno = 2786 (0xae2), region = 32  ;;  %s1784_s8 = sshll.u32 (!%p2771_p0), %s2456_s7, 4 }
  0x4e   : > { %s184_s10 = scalar_lea.sflag (!%p2771_p0), [#allocation4], %s2456_s7  ;;  %s2462_s30 = scalar_lea.vmem (!%p2771_p0), [#allocation3], %s1784_s8 }
  0x52   : > { %2250 = dma.done.wait (%p2772_p4), %s184_s10, 256  }
  0x53   : > { %2252 = vsyncadd (%p2772_p4), %s184_s10, 4294967040  ;;  %p2773_p8 = scmp.eq.s32.totalorder %s2344_s16, 0 }
  0x55   : > { %2254 = dma.done.wait (%p2773_p8), [#allocation7], 2304   ;;  %p2774_p7 = pmov %p2773_p8 }
  0x56   : > { %v2284_v0 = vmov 0.0   ;;  %v231_v1 = vld [vmem:[#allocation6 + $0x58] sm:$0xff]  ;;  %v230_v2 = vld [vmem:[#allocation6 + $0x50] sm:$0xff]  ;;  %v229_v3 = vld [vmem:[#allocation6 + $0x48] sm:$0xff]  ;;  %vm238_vm0 = vcmask 392192   ;;  %vm337_vm1 = vcmask 64512   ;;  %v322_v26 = vlaneseq }
  0x57   : > { %2256 = vsyncadd (%p2774_p7), [#allocation7], 4294964992  ;;  %309 = vmatprep.mubr.f32.mxu0 %v2284_v0  ;;  %265 = vmatprep.subr.mxu0 %v231_v1  ;;  %v228_v4 = vld [vmem:[#allocation6 + $0x40] sm:$0xff]  ;;  %v227_v5 = vld [vmem:[#allocation6 + $0x38] sm:$0xff]  ;;  %s2285_s18 = smov 72   ;;  %s2286_s20 = smov 80  }
  0x58   : > { %266 = vmatpush1.msra.mxu0 %v230_v2  ;;  %v226_v6 = vld [vmem:[#allocation6 + $0x30] sm:$0xff]  ;;  %v225_v7 = vld [vmem:[#allocation6 + $0x28] sm:$0xff]  ;;  %v224_v8 = vld [vmem:[#allocation6 + $0x20] sm:$0xff]  ;;  %s2287_s5 = smov 32   ;;  %s2288_s6 = smov 120   ;;  %v323_v27 = vshrl.u32 %v322_v26, 7 }
  0x59   : > { %267 = vmatprep.subr.mxu0 %v229_v3  ;;  %v223_v9 = vld [vmem:[#allocation6 + $0x18] sm:$0xff]  ;;  %v222_v10 = vld [vmem:[#allocation6 + $0x10] sm:$0xff]  ;;  %v221_v11 = vld [vmem:[#allocation6 + $0x8] sm:$0xff]  ;;  %s2289_s27 = smov 64   ;;  %s2290_s29 = smov 112   ;;  %v326_v29 = vand.u32 127, %v322_v26 }
  0x5a   : > { %268 = vmatpush1.msra.mxu0 %v228_v4  ;;  %v220_v12 = vld [vmem:[#allocation6] sm:$0xff]  ;;  %v219_v14 = vld [vmem:[%s2462_s30 + $0x8] sm:$0xff]  ;;  %v324_v28 = vadd.s32 8, %v323_v27  ;;  %v2291_v30 = vmov -1e+30   ;;  %vm421_vm4 = vcmask 130048  }
  0x5b   : > { %269 = vmatprep.subr.mxu0 %v227_v5  ;;  %v218_v13 = vld [vmem:[%s2462_s30] sm:$0xff]  ;;  %vm327_vm3 = vcmp.ge.s32.totalorder %v323_v27, %v326_v29  ;;  %s2292_s4 = smov 24   ;;  %s2293_s11 = smov 16   ;;  %vm741_vm5 = vcmask 130112   ;;  %vm952_vm6 = vcmask 195712   ;;  %vm1163_vm7 = vcmask 261312  }
  0x5c   : > { %270 = vmatpush1.msra.mxu0 %v226_v6  ;;  %vm328_vm2 = vcmp.ge.s32.totalorder %v324_v28, %v326_v29  ;;  %v2512_v33 = vsel %vm327_vm3, 0.0, %v2291_v30  ;;  %s2294_s23 = smov 56   ;;  %s2295_s24 = smov 104   ;;  %vm1368_vm8 = vcmask 326912   ;;  %vm1581_vm9 = vcmask 392512  }
  0x5d   : > { %271 = vmatprep.subr.mxu0 %v225_v7  ;;  %v2510_v31 = vsel %vm328_vm2, 0.0, %v2291_v30  ;;  %s2296_s22 = smov 8   ;;  %s2297_s25 = smov 48  }
  0x5e   : > { %272 = vmatpush1.msra.mxu0 %v224_v8  ;;  %s2298_s26 = smov 96   ;;  %s2299_s28 = smov 40  }
  0x5f   : > { %273 = vmatprep.subr.mxu0 %v223_v9  ;;  %s2300_s10 = smov 88   ;;  %s217_s30 = scalar_lea.vmem [#allocation9], %s1784_s8 }
  0x60   : > { %274 = vmatpush1.msra.mxu0 %v222_v10  ;;  %p2775_p10 = scmp.ne.s32.totalorder %s2769_s21, 0 }
  0x61   : > { %275 = vmatprep.subr.mxu0 %v221_v11 }
  0x62   : > { %276 = vmatpush1.msra.mxu0 %v220_v12 }
  0x63   : > { %1788 = vmatmul.mubr.msk.f32.vlgmr.msra.gmra.mxu0 %vm238_vm0, %v218_v13 }
  0x64   : > { %315 = vmatprep.mubr.f32.mxu0 %v2284_v0 }
  0x67   : > { %1789 = vmatmul.mubr.msk.f32.gmra.mxu0 %vm238_vm0, %v219_v14 }
 0x123   : > { %v2476_v15 = vpop.f32.mrf.mxu0 }
 0x124   : > { %1895 = vmatprep.mubr.msk.f32.mxu1 %vm337_vm1, %v2476_v15 }
 0x125   : > { %v2480_v16 = vpop.f32.mrf.mxu0 }
 0x127   : > { %v2482_v17 = vpop.f32.mrf.mxu0 }
 0x128   : > { %539 = vrot.lane.b32.xlu1 %v2482_v17, %s2285_s18  ;;  %335 = vrot.lane.b32.xlu0 %v2482_v17, %s2286_s20 }
 0x129   : > { %v2540_v51 = vpop.f32.mrf.mxu0 }
 0x12c   : > { %333 = vrot.lane.b32.xlu0 %v2476_v15, %s2286_s20  ;;  %s1834_s20 = sshll.u32 %s2344_s16, 8  ;;  %s2301_s16 = smov [#allocation9]  }
 0x130   : > { %442 = vrot.lane.b32.xlu0 %v2476_v15, %s2287_s5 }
 0x134   : > { %537 = vrot.lane.b32.xlu0 %v2476_v15, %s2285_s18  ;;  %s1683_s18 = sshll.u32 %s217_s30, 4  ;;  %s2705_s18 = int_to_ptr.vmem [resolvable:$true] %s1683_s18 }
 0x135   : > { %s2207_s8 = scalar_lea.vmem %s2705_s18, 256 }
 0x136   : > { %p2208_p11 = scmp.ne.s32.totalorder %s2705_s18, %s2207_s8 }
 0x138   : > { %533 = vrot.lane.b32.xlu0 %v2476_v15, %s2288_s6  ;;  %p2209_p1 = pnand %p2208_p11, %p2775_p10 }
 0x13a   : > { %p2210_p2 = pneg %p2209_p1 }
 0x13c   : > { %444 = vrot.lane.b32.xlu0 %v2482_v17, %s2287_s5 }
 0x140   : > { %750 = vrot.lane.b32.xlu0 %v2482_v17, %s2289_s27 }
 0x144   : > { %748 = vrot.lane.b32.xlu0 %v2476_v15, %s2289_s27  ;;  %s2711_s27 = scalar_lea.hbm %s2759_s3, %s1834_s20 }
 0x148   : > { %746 = vrot.lane.b32.xlu0 %v2482_v17, %s2290_s29 }
 0x19a   : > { %v540_v18 = vpop.permute.xlu1 %539  ;;  %v336_v19 = vpop.permute.xlu0 %335 }
 0x19b   : > { %1891 = vmatprep.subr.msk.mxu1 %vm337_vm1, %v336_v19  ;;  %1905 = vmatprep.subr.msk.mxu0 %vm337_vm1, %v540_v18 }
 0x19c   : > { %1892 = vmatpush3.xpose.msk.msra.mxu1 %vm337_vm1, %v336_v19  ;;  %1906 = vmatpush3.xpose.msk.msra.mxu0 %vm337_vm1, %v540_v18 }
 0x19e   : > { %v334_v20 = vpop.permute.xlu0 %333 }
 0x19f   : > { %1893 = vmatprep.subr.msk.mxu1 %vm337_vm1, %v334_v20 }
 0x1a0   : > { %1894 = vmatpush3.xpose.msk.msra.mxu1 %vm337_vm1, %v334_v20 }
 0x1a2   : > { %v443_v21 = vpop.permute.xlu0 %442 }
 0x1a3   : > { %1896 = vmatmul.mubr.msk.f32.vlgmr.msra.gmra.mxu1 %vm337_vm1, %v2482_v17 }
 0x1a6   : > { %v538_v22 = vpop.permute.xlu0 %537 }
 0x1a7   : > { %1907 = vmatprep.subr.msk.mxu0 %vm337_vm1, %v538_v22 }
 0x1a8   : > { %1908 = vmatpush3.xpose.msk.msra.mxu0 %vm337_vm1, %v538_v22 }
 0x1aa   : > { %v534_v23 = vpop.permute.xlu0 %533 }
 0x1ab   : > { %1909 = vmatprep.mubr.msk.f32.mxu0 %vm337_vm1, %v534_v23 }
 0x1ae   : > { %v445_v24 = vpop.permute.xlu0 %444 }
 0x1af   : > { %1898 = vmatprep.subr.mxu1 %v445_v24 }
 0x1b0   : > { %1899 = vmatpush3.msra.mxu1 %v445_v24 }
 0x1b1   : > { %1900 = vmatprep.subr.mxu1 %v443_v21 }
 0x1b2   : > { %1901 = vmatpush3.msra.mxu1 %v443_v21  ;;  %v751_v25 = vpop.permute.xlu0 %750 }
 0x1b3   : > { %1919 = vmatprep.subr.msk.mxu1 %vm337_vm1, %v751_v25 }
 0x1b6   : > { %v749_v49 = vpop.permute.xlu0 %748 }
 0x1ba   : > { %v747_v50 = vpop.permute.xlu0 %746 }
 0x263   : > { %v1897_v32 = vpop.f32.mrf.mxu1 }
 0x264   : > { %v418_v34 = vadd.f32 %v1897_v32, %v2510_v31 }
 0x265   : > { %v412_v35 = vpop.f32.mrf.mxu1 }
 0x266   : > { %v413_v36 = vadd.f32 %v412_v35, %v2512_v33  ;;  %v425_v37 = vsel %vm421_vm4, %v418_v34, -inf }
 0x267   : > { %426 = vmax.xlane.f32.xlu1 %v425_v37 }
 0x268   : > { %v422_v38 = vsel %vm421_vm4, %v413_v36, -inf }
 0x26b   : > { %423 = vmax.xlane.f32.xlu1 %v422_v38 }
 0x27c   : > { %535 = vrot.lane.b32.xlu1 %v2482_v17, %s2288_s6 }
 0x280   : > { %744 = vrot.lane.b32.xlu1 %v2476_v15, %s2290_s29  ;;  %s1670_s29 = scalar_lea.sflag [#allocation5], %s2456_s7 }
 0x284   : > { %644 = vrot.lane.b32.xlu1 %v2476_v15, %s2292_s4 }
 0x288   : > { %857 = vrot.lane.b32.xlu1 %v2482_v17, %s2293_s11 }
 0x2f0   : > { %v427_v39 = vpop.xlane.xlu1 %426 }
 0x2f1   : > { %v429_v40 = vsub.f32 %v418_v34, %v427_v39 }
 0x2f3   : > { %v432_v43 = vmul.f32 1.442695, %v429_v40 }
 0x2f4   : > { %v424_v41 = vpop.xlane.xlu1 %423 }
 0x2f5   : > { %v428_v42 = vsub.f32 %v413_v36, %v424_v41 }
 0x2f7   : > { %v430_v44 = vmul.f32 1.442695, %v428_v42 }
 0x2f8   : > { %v536_v45 = vpop.permute.xlu1 %535 }
 0x2f9   : > { %2079 = vpow2.f32 %v430_v44  ;;  %1910 = vmatmul.mubr.msk.f32.vlgmr.msra.gmra.mxu0 %vm337_vm1, %v536_v45 }
 0x2fa   : > { %2081 = vpow2.f32 %v432_v43 }
 0x2fc   : > { %v745_v48 = vpop.permute.xlu1 %744 }
 0x300   : > { %v645_v2 = vpop.permute.xlu1 %644 }
 0x304   : > { %v858_v3 = vpop.permute.xlu1 %857 }
 0x306   : > { %v2527_v46 = vpop.eup %2079 }
 0x307   : > { %v2529_v47 = vpop.eup %2081  ;;  %1902 = vmatprep.mubr.msk.f32.mxu1 %vm421_vm4, %v2527_v46 }
 0x308   : > { %1903 = vmatmul.mubr.msk.f32.vlgmr.msra.gmra.mxu1 %vm421_vm4, %v2529_v47 }
 0x309   : > { %1920 = vmatpush3.xpose.msk.msra.mxu1 %vm337_vm1, %v751_v25  ;;  %1923 = vmatprep.mubr.msk.f32.mxu1 %vm337_vm1, %v745_v48 }
 0x30a   : > { %1921 = vmatprep.subr.msk.mxu1 %vm337_vm1, %v749_v49 }
 0x30d   : > { %1922 = vmatpush3.xpose.msk.msra.mxu1 %vm337_vm1, %v749_v49 }
 0x310   : > { %1924 = vmatmul.mubr.msk.f32.vlgmr.msra.gmra.mxu1 %vm337_vm1, %v747_v50 }
 0x3b9   : > { %v1911_v52 = vpop.f32.mrf.mxu0 }
 0x3ba   : > { %v621_v53 = vadd.f32 %v1911_v52, %v2510_v31 }
 0x3bb   : > { %v615_v54 = vpop.f32.mrf.mxu0 }
 0x3bc   : > { %v616_v55 = vadd.f32 %v615_v54, %v2512_v33  ;;  %v627_v56 = vsel %vm421_vm4, %v621_v53, -inf }
 0x3bd   : > { %628 = vmax.xlane.f32.xlu0 %v627_v56 }
 0x3be   : > { %v624_v57 = vsel %vm421_vm4, %v616_v55, -inf }
 0x3bf   : > { %625 = vmax.xlane.f32.xlu1 %v624_v57 }
 0x3c8   : > { %v2546_v58 = vpop.f32.mrf.mxu1 }
 0x3ca   : > { %v2548_v59 = vpop.f32.mrf.mxu1 }
 0x3d0   : > { %v1925_v60 = vpop.f32.mrf.mxu1 }
 0x3d1   : > { %v832_v61 = vadd.f32 %v1925_v60, %v2510_v31 }
 0x3d2   : > { %v826_v63 = vpop.f32.mrf.mxu1 }
 0x3d3   : > { %646 = vrot.lane.b32.xlu0 %v2482_v17, %s2292_s4  ;;  %v838_v62 = vsel %vm421_vm4, %v832_v61, -inf  ;;  %v827_v0 = vadd.f32 %v826_v63, %v2512_v33 }
 0x3d4   : > { %839 = vmax.xlane.f32.xlu1 %v838_v62 }
 0x3d5   : > { %v835_v1 = vsel %vm421_vm4, %v827_v0, -inf }
 0x3e5   : > { %961 = vrot.lane.b32.xlu1 %v2482_v17, %s2294_s23 }
 0x3e9   : > { %955 = vrot.lane.b32.xlu1 %v2476_v15, %s2295_s24 }
 0x3ed   : > { %1066 = vrot.lane.b32.xlu1 %v2476_v15, %s2296_s22 }
 0x3f2   : > { %836 = vmax.xlane.f32.xlu0 %v835_v1 }
 0x408   : > { %855 = vrot.lane.b32.xlu0 %v2476_v15, %s2293_s11 }
 0x40c   : > { %959 = vrot.lane.b32.xlu0 %v2476_v15, %s2294_s23 }
 0x410   : > { %957 = vrot.lane.b32.xlu0 %v2482_v17, %s2295_s24 }
 0x446   : > { %v629_v4 = vpop.xlane.xlu0 %628 }
 0x447   : > { %v631_v5 = vsub.f32 %v621_v53, %v629_v4 }
 0x448   : > { %v626_v6 = vpop.xlane.xlu1 %625 }
 0x449   : > { %v630_v7 = vsub.f32 %v616_v55, %v626_v6  ;;  %v634_v8 = vmul.f32 1.442695, %v631_v5 }
 0x44a   : > { %v647_v9 = vpop.permute.xlu0 %646 }
 0x44b   : > { %v632_v10 = vmul.f32 1.442695, %v630_v7  ;;  %1912 = vmatprep.subr.mxu0 %v647_v9 }
 0x44c   : > { %1913 = vmatpush3.msra.mxu0 %v647_v9 }
 0x44d   : > { %2083 = vpow2.f32 %v632_v10  ;;  %1914 = vmatprep.subr.mxu0 %v645_v2 }
 0x44e   : > { %2085 = vpow2.f32 %v634_v8  ;;  %1915 = vmatpush3.msra.mxu0 %v645_v2 }
 0x44f   : > { %1926 = vmatprep.subr.mxu0 %v858_v3 }
 0x45a   : > { %v2564_v11 = vpop.eup %2083 }
 0x45b   : > { %v2566_v12 = vpop.eup %2085  ;;  %1916 = vmatprep.mubr.msk.f32.mxu0 %vm421_vm4, %v2564_v11 }
 0x45c   : > { %1917 = vmatmul.mubr.msk.f32.vlgmr.msra.gmra.mxu0 %vm421_vm4, %v2566_v12 }
 0x45d   : > { %1927 = vmatpush3.msra.mxu0 %v858_v3  ;;  %v840_v13 = vpop.xlane.xlu1 %839 }
 0x45e   : > { %v842_v14 = vsub.f32 %v832_v61, %v840_v13 }
 0x460   : > { %v845_v20 = vmul.f32 1.442695, %v842_v14 }
 0x461   : > { %v962_v23 = vpop.permute.xlu1 %961 }
 0x465   : > { %v956_v26 = vpop.permute.xlu1 %955 }
 0x469   : > { %v1067_v41 = vpop.permute.xlu1 %1066 }
 0x47b   : > { %v837_v18 = vpop.xlane.xlu0 %836 }
 0x47c   : > { %v841_v19 = vsub.f32 %v827_v0, %v837_v18 }
 0x47e   : > { %v843_v21 = vmul.f32 1.442695, %v841_v19 }
 0x47f   : > { %v856_v22 = vpop.permute.xlu0 %855 }
 0x480   : > { %2087 = vpow2.f32 %v843_v21  ;;  %1928 = vmatprep.subr.mxu0 %v856_v22 }
 0x481   : > { %2089 = vpow2.f32 %v845_v20  ;;  %1929 = vmatpush3.msra.mxu0 %v856_v22 }
 0x482   : > { %1933 = vmatprep.subr.msk.mxu0 %vm337_vm1, %v962_v23 }
 0x483   : > { %v960_v27 = vpop.permute.xlu0 %959 }
 0x487   : > { %v958_v28 = vpop.permute.xlu0 %957 }
 0x48d   : > { %v2573_v24 = vpop.eup %2087 }
 0x48e   : > { %v2575_v25 = vpop.eup %2089  ;;  %1930 = vmatprep.mubr.msk.f32.mxu0 %vm421_vm4, %v2573_v24 }
 0x48f   : > { %1931 = vmatmul.mubr.msk.f32.vlgmr.msra.gmra.mxu0 %vm421_vm4, %v2575_v25 }
 0x490   : > { %1934 = vmatpush3.xpose.msk.msra.mxu0 %vm337_vm1, %v962_v23  ;;  %1937 = vmatprep.mubr.msk.f32.mxu0 %vm337_vm1, %v956_v26 }
 0x491   : > { %1935 = vmatprep.subr.msk.mxu0 %vm337_vm1, %v960_v27 }
 0x494   : > { %1936 = vmatpush3.xpose.msk.msra.mxu0 %vm337_vm1, %v960_v27 }
 0x495   : > { %1954 = vmatprep.subr.mxu0 %v2540_v51 }
 0x497   : > { %1938 = vmatmul.mubr.msk.f32.vlgmr.msra.gmra.mxu0 %vm337_vm1, %v958_v28 }
 0x498   : > { %1955 = vmatpush3.msra.mxu0 %v2540_v51 }
 0x499   : > { %1956 = vmatprep.subr.mxu0 %v2480_v16 }
 0x49a   : > { %1957 = vmatpush3.msra.mxu0 %v2480_v16 }
 0x51c   : > { %v2590_v29 = vpop.f32.mrf.mxu0 }
 0x51e   : > { %v2592_v30 = vpop.f32.mrf.mxu0 }
 0x54f   : > { %v2594_v32 = vpop.f32.mrf.mxu0 }
 0x551   : > { %v2596_v34 = vpop.f32.mrf.mxu0 }
 0x557   : > { %v1939_v35 = vpop.f32.mrf.mxu0 }
 0x558   : > { %v1043_v36 = vadd.f32 %v1939_v35, %v2510_v31  ;;  %v639_v35 = vsel %vm421_vm4, %v2566_v12, 0.0 }
 0x559   : > { %v1037_v37 = vpop.f32.mrf.mxu0 }
 0x55a   : > { %v1038_v38 = vadd.f32 %v1037_v37, %v2512_v33  ;;  %v1049_v39 = vsel %vm421_vm4, %v1043_v36, -inf }
 0x55b   : > { %1050 = vmax.xlane.f32.xlu0 %v1049_v39 }
 0x55c   : > { %v1046_v40 = vsel %vm421_vm4, %v1038_v38, -inf }
 0x55d   : > { %1047 = vmax.xlane.f32.xlu1 %v1046_v40 }
 0x56e   : > { %1172 = vrot.lane.b32.xlu1 %v2482_v17, %s2297_s25 }
 0x571   : > { %1068 = vrot.lane.b32.xlu0 %v2482_v17, %s2296_s22 }
 0x572   : > { %1166 = vrot.lane.b32.xlu1 %v2476_v15, %s2298_s26 }
 0x575   : > { %1170 = vrot.lane.b32.xlu0 %v2476_v15, %s2297_s25 }
 0x579   : > { %1168 = vrot.lane.b32.xlu0 %v2482_v17, %s2298_s26 }
 0x5e4   : > { %v1051_v42 = vpop.xlane.xlu0 %1050 }
 0x5e5   : > { %v1053_v43 = vsub.f32 %v1043_v36, %v1051_v42  ;;  %v850_v36 = vsel %vm421_vm4, %v2575_v25, 0.0 }
 0x5e6   : > { %v1048_v44 = vpop.xlane.xlu1 %1047 }
 0x5e7   : > { %v1052_v45 = vsub.f32 %v1038_v38, %v1048_v44  ;;  %v1056_v48 = vmul.f32 1.442695, %v1053_v43 }
 0x5e8   : > { %v1069_v49 = vpop.permute.xlu0 %1068 }
 0x5e9   : > { %v1054_v50 = vmul.f32 1.442695, %v1052_v45  ;;  %1940 = vmatprep.subr.mxu1 %v1069_v49 }
 0x5ea   : > { %1941 = vmatpush3.msra.mxu1 %v1069_v49  ;;  %v1173_v52 = vpop.permute.xlu1 %1172  ;;  %v437_v49 = vsel %vm421_vm4, %v2529_v47, 0.0 }
 0x5eb   : > { %2091 = vpow2.f32 %v1054_v50  ;;  %1942 = vmatprep.subr.mxu1 %v1067_v41  ;;  %v434_v50 = vsel %vm421_vm4, %v2527_v46, 0.0 }
 0x5ec   : > { %2093 = vpow2.f32 %v1056_v48  ;;  %1943 = vmatpush3.msra.mxu1 %v1067_v41  ;;  %v1171_v56 = vpop.permute.xlu0 %1170 }
 0x5ed   : > { %1947 = vmatprep.subr.msk.mxu1 %vm337_vm1, %v1173_v52 }
 0x5ee   : > { %v1167_v55 = vpop.permute.xlu1 %1166 }
 0x5f0   : > { %v1169_v57 = vpop.permute.xlu0 %1168 }
 0x5f8   : > { %v2609_v53 = vpop.eup %2091 }
 0x5f9   : > { %v2611_v54 = vpop.eup %2093  ;;  %1944 = vmatprep.mubr.msk.f32.mxu1 %vm421_vm4, %v2609_v53 }
 0x5fa   : > { %1945 = vmatmul.mubr.msk.f32.vlgmr.msra.gmra.mxu1 %vm421_vm4, %v2611_v54 }
 0x5fb   : > { %1948 = vmatpush3.xpose.msk.msra.mxu1 %vm337_vm1, %v1173_v52  ;;  %1951 = vmatprep.mubr.msk.f32.mxu1 %vm337_vm1, %v1167_v55 }
 0x5fc   : > { %1949 = vmatprep.subr.msk.mxu1 %vm337_vm1, %v1171_v56 }
 0x5ff   : > { %1950 = vmatpush3.xpose.msk.msra.mxu1 %vm337_vm1, %v1171_v56 }
 0x602   : > { %1952 = vmatmul.mubr.msk.f32.vlgmr.msra.gmra.mxu1 %vm337_vm1, %v1169_v57 }
 0x6ba   : > { %v2622_v60 = vpop.f32.mrf.mxu1 }
 0x6bc   : > { %v2624_v61 = vpop.f32.mrf.mxu1 }
 0x6c2   : > { %v1953_v62 = vpop.f32.mrf.mxu1 }
 0x6c3   : > { %v1254_v63 = vadd.f32 %v1953_v62, %v2510_v31 }
 0x6c4   : > { %v1248_v0 = vpop.f32.mrf.mxu1 }
 0x6c5   : > { %v1249_v1 = vadd.f32 %v1248_v0, %v2512_v33  ;;  %v1260_v2 = vsel %vm421_vm4, %v1254_v63, -inf }
 0x6c6   : > { %1261 = vmax.xlane.f32.xlu0 %v1260_v2 }
 0x6c7   : > { %v1257_v3 = vsel %vm421_vm4, %v1249_v1, -inf }
 0x6c8   : > { %1258 = vmax.xlane.f32.xlu1 %v1257_v3 }
 0x6d9   : > { %1375 = vrot.lane.b32.xlu1 %v2476_v15, %s2299_s28 }
 0x6dc   : > { %1377 = vrot.lane.b32.xlu0 %v2482_v17, %s2299_s28 }
 0x6dd   : > { %1371 = vrot.lane.b32.xlu1 %v2476_v15, %s2300_s10 }
 0x6e0   : > { %1373 = vrot.lane.b32.xlu0 %v2482_v17, %s2300_s10 }
 0x74f   : > { %v1262_v4 = vpop.xlane.xlu0 %1261 }
 0x750   : > { %v1264_v5 = vsub.f32 %v1254_v63, %v1262_v4 }
 0x751   : > { %v1259_v6 = vpop.xlane.xlu1 %1258 }
 0x752   : > { %v1263_v7 = vsub.f32 %v1249_v1, %v1259_v6  ;;  %v1267_v8 = vmul.f32 1.442695, %v1264_v5 }
 0x753   : > { %v1378_v9 = vpop.permute.xlu0 %1377 }
 0x754   : > { %v1265_v10 = vmul.f32 1.442695, %v1263_v7  ;;  %1961 = vmatprep.subr.msk.mxu0 %vm337_vm1, %v1378_v9 }
 0x755   : > { %v1376_v13 = vpop.permute.xlu1 %1375 }
 0x756   : > { %2095 = vpow2.f32 %v1265_v10  ;;  %v237_v10 = vld [vmem:[#allocation8 + $0x28] sm:$0xff] }
 0x757   : > { %2097 = vpow2.f32 %v1267_v8  ;;  %v1374_v15 = vpop.permute.xlu0 %1373 }
 0x759   : > { %v1372_v19 = vpop.permute.xlu1 %1371 }
 0x763   : > { %v2096_v14 = vpop.eup %2095 }
 0x764   : > { %v2098_v18 = vpop.eup %2097  ;;  %1958 = vmatprep.mubr.msk.f32.mxu0 %vm421_vm4, %v2096_v14  ;;  %v1269_v12 = vsel %vm421_vm4, %v2096_v14, 0.0 }
 0x765   : > { %1959 = vmatmul.mubr.msk.f32.vlgmr.msra.gmra.mxu0 %vm421_vm4, %v2098_v18 }
 0x766   : > { %1962 = vmatpush3.xpose.msk.msra.mxu0 %vm337_vm1, %v1378_v9  ;;  %1965 = vmatprep.mubr.msk.f32.mxu0 %vm337_vm1, %v1372_v19 }
 0x767   : > { %1963 = vmatprep.subr.msk.mxu0 %vm337_vm1, %v1376_v13 }
 0x76a   : > { %1964 = vmatpush3.xpose.msk.msra.mxu0 %vm337_vm1, %v1376_v13 }
 0x76d   : > { %1966 = vmatmul.mubr.msk.f32.vlgmr.msra.gmra.mxu0 %vm337_vm1, %v1374_v15 }
 0x825   : > { %v2644_v17 = vpop.f32.mrf.mxu0 }
 0x827   : > { %v2646_v20 = vpop.f32.mrf.mxu0 }
 0x82d   : > { %v1967_v21 = vpop.f32.mrf.mxu0 }
 0x82e   : > { %v1459_v22 = vadd.f32 %v1967_v21, %v2510_v31  ;;  %v636_v31 = vsel %vm421_vm4, %v2564_v11, 0.0  ;;  %v1272_v11 = vsel %vm421_vm4, %v2098_v18, 0.0 }
 0x82f   : > { %v1453_v23 = vpop.f32.mrf.mxu0 }
 0x830   : > { %v1454_v26 = vadd.f32 %v1453_v23, %v2512_v33  ;;  %v1465_v27 = vsel %vm421_vm4, %v1459_v22, -inf  ;;  %v847_v33 = vsel %vm421_vm4, %v2573_v24, 0.0 }
 0x831   : > { %1466 = vmax.xlane.f32.xlu0 %v1465_v27 }
 0x832   : > { %v1462_v28 = vsel %vm421_vm4, %v1454_v26, -inf }
 0x833   : > { %1463 = vmax.xlane.f32.xlu1 %v1462_v28  ;;  %v236_v28 = vld [vmem:[#allocation8 + $0x20] sm:$0xff] }
 0x844   : > { %1484 = vrot.lane.b32.xlu1 %v2480_v16, %s2288_s6  ;;  %v1058_v16 = vsel %vm421_vm4, %v2609_v53, 0.0 }
 0x847   : > { %1486 = vrot.lane.b32.xlu0 %v2540_v51, %s2288_s6  ;;  %v1061_v51 = vsel %vm421_vm4, %v2611_v54, 0.0 }
 0x866   : > { %640 = vadd.xlane.f32.xlu0 %v639_v35  ;;  %v235_v35 = vld [vmem:[#allocation8 + $0x18] sm:$0xff] }
 0x868   : > { %637 = vadd.xlane.f32.xlu1 %v636_v31  ;;  %v234_v31 = vld [vmem:[#allocation8 + $0x10] sm:$0xff] }
 0x86a   : > { %848 = vadd.xlane.f32.xlu0 %v847_v33  ;;  %v233_v33 = vld [vmem:[#allocation8 + $0x8] sm:$0xff] }
 0x86c   : > { %851 = vadd.xlane.f32.xlu1 %v850_v36  ;;  %v232_v36 = vld [vmem:[#allocation8] sm:$0xff] }
 0x86e   : > { %1059 = vadd.xlane.f32.xlu0 %v1058_v16 }
 0x870   : > { %1062 = vadd.xlane.f32.xlu1 %v1061_v51 }
 0x872   : > { %1270 = vadd.xlane.f32.xlu0 %v1269_v12 }
 0x874   : > { %1273 = vadd.xlane.f32.xlu1 %v1272_v11 }
 0x8ba   : > { %v1467_v24 = vpop.xlane.xlu0 %1466 }
 0x8bb   : > { %v1469_v37 = vsub.f32 %v1459_v22, %v1467_v24 }
 0x8bc   : > { %v1464_v38 = vpop.xlane.xlu1 %1463 }
 0x8bd   : > { %v1472_v39 = vmul.f32 1.442695, %v1469_v37  ;;  %v1468_v25 = vsub.f32 %v1454_v26, %v1464_v38 }
 0x8be   : > { %v1487_v40 = vpop.permute.xlu0 %1486 }
 0x8bf   : > { %2099 = vpow2.f32 %v1472_v39  ;;  %v1470_v41 = vmul.f32 1.442695, %v1468_v25  ;;  %1968 = vmatprep.subr.mxu1 %v1487_v40 }
 0x8c0   : > { %1969 = vmatpush3.msra.mxu1 %v1487_v40  ;;  %v1485_v42 = vpop.permute.xlu1 %1484 }
 0x8c1   : > { %2101 = vpow2.f32 %v1470_v41  ;;  %1970 = vmatprep.subr.mxu1 %v1485_v42 }
 0x8c2   : > { %1971 = vmatpush3.msra.mxu1 %v1485_v42 }
 0x8c3   : > { %1975 = vmatprep.subr.mxu1 %v237_v10 }
 0x8cc   : > { %v2100_v43 = vpop.eup %2099 }
 0x8cd   : > { %v1477_v44 = vsel %vm421_vm4, %v2100_v43, 0.0 }
 0x8ce   : > { %v2102_v45 = vpop.eup %2101  ;;  %1478 = vadd.xlane.f32.xlu1 %v1477_v44 }
 0x8cf   : > { %1972 = vmatprep.mubr.msk.f32.mxu1 %vm421_vm4, %v2102_v45  ;;  %v1474_v48 = vsel %vm421_vm4, %v2102_v45, 0.0 }
 0x8d0   : > { %1475 = vadd.xlane.f32.xlu0 %v1474_v48  ;;  %1973 = vmatmul.mubr.msk.f32.vlgmr.msra.gmra.mxu1 %vm421_vm4, %v2100_v43 }
 0x8d1   : > { %1976 = vmatpush3.msra.mxu1 %v237_v10 }
 0x8d2   : > { %438 = vadd.xlane.f32.xlu1 %v437_v49  ;;  %1977 = vmatprep.subr.mxu1 %v236_v28 }
 0x8d3   : > { %1978 = vmatpush3.msra.mxu1 %v236_v28 }
 0x8d4   : > { %435 = vadd.xlane.f32.xlu0 %v434_v50  ;;  %1979 = vmatprep.subr.mxu1 %v235_v35 }
 0x8d5   : > { %1980 = vmatpush3.msra.mxu1 %v235_v35 }
 0x8d6   : > { %1981 = vmatprep.subr.mxu1 %v234_v31 }
 0x8d7   : > { %1982 = vmatpush3.msra.mxu1 %v234_v31 }
 0x8d8   : > { %1983 = vmatprep.subr.mxu1 %v233_v33 }
 0x8d9   : > { %1984 = vmatpush3.msra.mxu1 %v233_v33 }
 0x8da   : > { %1985 = vmatprep.subr.mxu1 %v232_v36 }
 0x8db   : > { %1986 = vmatpush3.msra.mxu1 %v232_v36 }
 0x8ef   : > { %v641_v52 = vpop.xlane.xlu0 %640 }
 0x8f0   : > { %2103 = vrcp.f32 %v641_v52 }
 0x8f1   : > { %v638_v53 = vpop.xlane.xlu1 %637 }
 0x8f2   : > { %2105 = vrcp.f32 %v638_v53 }
 0x8f3   : > { %v849_v54 = vpop.xlane.xlu0 %848 }
 0x8f4   : > { %2107 = vrcp.f32 %v849_v54 }
 0x8f5   : > { %v852_v55 = vpop.xlane.xlu1 %851 }
 0x8f6   : > { %2109 = vrcp.f32 %v852_v55 }
 0x8f7   : > { %v1060_v56 = vpop.xlane.xlu0 %1059 }
 0x8f8   : > { %2111 = vrcp.f32 %v1060_v56 }
 0x8f9   : > { %v1063_v57 = vpop.xlane.xlu1 %1062 }
 0x8fa   : > { %2113 = vrcp.f32 %v1063_v57 }
 0x8fb   : > { %v1271_v62 = vpop.xlane.xlu0 %1270 }
 0x8fc   : > { %2115 = vrcp.f32 %v1271_v62 }
 0x8fd   : > { %v2104_v47 = vpop.eup %2103  ;;  %v1274_v63 = vpop.xlane.xlu1 %1273 }
 0x8fe   : > { %2117 = vrcp.f32 %v1274_v63  ;;  %v732_v46 = vmul.f32 %v2104_v47, %v2590_v29 }
 0x8ff   : > { %v2106_v0 = vpop.eup %2105 }
 0x900   : > { %737 = vrot.lane.b32.xlu1 %v732_v46, %s2296_s22  ;;  %v731_v1 = vmul.f32 %v2106_v0, %v2592_v30 }
 0x901   : > { %v2108_v2 = vpop.eup %2107 }
 0x902   : > { %735 = vrot.lane.b32.xlu0 %v731_v1, %s2296_s22  ;;  %v942_v3 = vmul.f32 %v2108_v2, %v2596_v34 }
 0x903   : > { %v2110_v4 = vpop.eup %2109 }
 0x904   : > { %946 = vrot.lane.b32.xlu1 %v942_v3, %s2293_s11  ;;  %v943_v5 = vmul.f32 %v2110_v4, %v2594_v32 }
 0x905   : > { %v2112_v6 = vpop.eup %2111 }
 0x906   : > { %948 = vrot.lane.b32.xlu0 %v943_v5, %s2293_s11  ;;  %v1153_v29 = vmul.f32 %v2112_v6, %v2624_v61 }
 0x907   : > { %v2114_v7 = vpop.eup %2113 }
 0x908   : > { %1157 = vrot.lane.b32.xlu1 %v1153_v29, %s2292_s4  ;;  %v1154_v30 = vmul.f32 %v2114_v7, %v2622_v60 }
 0x909   : > { %v2116_v8 = vpop.eup %2115 }
 0x90a   : > { %1159 = vrot.lane.b32.xlu0 %v1154_v30, %s2292_s4  ;;  %v1358_v34 = vmul.f32 %v2116_v8, %v2646_v20  ;;  %s2211_s4 = sshll.u32 %s2301_s16, 4  ;;  %s2212_s4 = int_to_ptr.vmem [resolvable:$false] %s2211_s4 }
 0x90b   : > { %v2118_v9 = vpop.eup %2117  ;;  %s2213_s11 = scalar_lea.vmem %s2212_s4, 512  ;;  %p2214_p6 = scmp.lt.s32.totalorder %s2705_s18, %s2212_s4 }
 0x90c   : > { %1362 = vrot.lane.b32.xlu1 %v1358_v34, %s2287_s5  ;;  %v1359_v32 = vmul.f32 %v2118_v9, %v2644_v17  ;;  %p2215_p12 = scmp.lt.s32.totalorder %s2213_s11, %s2207_s8 }
 0x90e   : > { %1364 = vrot.lane.b32.xlu0 %v1359_v32, %s2287_s5  ;;  %p2216_p3 = por %p2215_p12, %p2214_p6 }
 0x910   : > { %p2217_p9 = pnand %p2216_p3, %p2210_p2 }
 0x957   : > { %v1479_v61 = vpop.xlane.xlu1 %1478 }
 0x959   : > { %v1476_v13 = vpop.xlane.xlu0 %1475 }
 0x95b   : > { %v439_v14 = vpop.xlane.xlu1 %438 }
 0x95c   : > { %2119 = vrcp.f32 %v439_v14 }
 0x95d   : > { %v436_v60 = vpop.xlane.xlu0 %435 }
 0x95e   : > { %2121 = vrcp.f32 %v436_v60 }
 0x95f   : > { %2123 = vrcp.f32 %v1479_v61 }
 0x960   : > { %2125 = vrcp.f32 %v1476_v13 }
 0x969   : > { %v2120_v18 = vpop.eup %2119 }
 0x96a   : > { %v530_v19 = vmul.f32 %v2120_v18, %v2546_v58 }
 0x96b   : > { %v2122_v15 = vpop.eup %2121 }
 0x96c   : > { %532 = vst.msk [vmem:[#allocation2 + $0x8] sm:$0xff] %vm337_vm1, %v530_v19  ;;  %v529_v20 = vmul.f32 %v2122_v15, %v2548_v59  ;;  %v2124_v16 = vpop.eup %2123 }
 0x96d   : > { %v2126_v11 = vpop.eup %2125 }
 0x96e   : > { %531 = vst.msk [vmem:[#allocation2] sm:$0xff] %vm337_vm1, %v529_v20 }
 0x972   : > { %v738_v17 = vpop.permute.xlu1 %737 }
 0x973   : > { %743 = vst.msk [vmem:[#allocation2 + $0x8] sm:$0xff] %vm741_vm5, %v738_v17 }
 0x974   : > { %v736_v21 = vpop.permute.xlu0 %735 }
 0x975   : > { %742 = vst.msk [vmem:[#allocation2] sm:$0xff] %vm741_vm5, %v736_v21 }
 0x976   : > { %v947_v22 = vpop.permute.xlu1 %946 }
 0x977   : > { %953 = vst.msk [vmem:[#allocation2] sm:$0xff] %vm952_vm6, %v947_v22 }
 0x978   : > { %v949_v23 = vpop.permute.xlu0 %948 }
 0x979   : > { %954 = vst.msk [vmem:[#allocation2 + $0x8] sm:$0xff] %vm952_vm6, %v949_v23 }
 0x97a   : > { %v1158_v26 = vpop.permute.xlu1 %1157 }
 0x97b   : > { %1164 = vst.msk [vmem:[#allocation2] sm:$0xff] %vm1163_vm7, %v1158_v26 }
 0x97c   : > { %v1160_v58 = vpop.permute.xlu0 %1159 }
 0x97d   : > { %1165 = vst.msk [vmem:[#allocation2 + $0x8] sm:$0xff] %vm1163_vm7, %v1160_v58 }
 0x97e   : > { %v1363_v27 = vpop.permute.xlu1 %1362 }
 0x97f   : > { %1369 = vst.msk [vmem:[#allocation2] sm:$0xff] %vm1368_vm8, %v1363_v27 }
 0x980   : > { %v1365_v59 = vpop.permute.xlu0 %1364 }
 0x981   : > { %1370 = vst.msk [vmem:[#allocation2 + $0x8] sm:$0xff] %vm1368_vm8, %v1365_v59 }
 0x990   : > { %v1974_v51 = vpop.f32.mrf.mxu1 }
 0x991   : > { %v1572_v12 = vmul.f32 %v2124_v16, %v1974_v51 }
 0x992   : > { %v1562_v24 = vpop.f32.mrf.mxu1 }
 0x993   : > { %v1571_v37 = vmul.f32 %v2126_v11, %v1562_v24  ;;  %1577 = vrot.lane.b32.xlu0 %v1572_v12, %s2299_s28 }
 0x995   : > { %1575 = vrot.lane.b32.xlu1 %v1571_v37, %s2299_s28 }
 0xa05   : > { %v1578_v38 = vpop.permute.xlu0 %1577 }
 0xa06   : > { %1583 = vst.msk [vmem:[#allocation2 + $0x8] sm:$0xff] %vm1581_vm9, %v1578_v38 }
 0xa07   : > { %v1576_v39 = vpop.permute.xlu1 %1575 }
 0xa08   : > { %1582 = vst.msk [vmem:[#allocation2] sm:$0xff] %vm1581_vm9, %v1576_v39 }
 0xa0d   : > { %v1585_v40 = vld [vmem:[#allocation2 + $0x8] sm:$0xff] }
 0xa0f   : > { %v1584_v25 = vld [vmem:[#allocation2] sm:$0xff] }
 0xa10   : > { %1987 = vmatprep.mubr.msk.f32.mxu1 %vm238_vm0, %v1584_v25 }
 0xa11   : > { %1988 = vmatmul.mubr.msk.f32.vlgmr.msra.gmra.mxu1 %vm238_vm0, %v1585_v40 }
 0xad1   : > { %v1989_v41 = vpop.f32.mrf.mxu1 }
 0xad2   : > { %1668 = vst.msk [vmem:[%s217_s30 + $0x8] sm:$0xff] %vm238_vm0, %v1989_v41 }
 0xad3   : > { %v1658_v42 = vpop.f32.mrf.mxu1 }
 0xad4   : > { %1667 = vst.msk [vmem:[%s217_s30] sm:$0xff] %vm238_vm0, %v1658_v42 }
 0xad5   : > { %2220 = shalt.err (!%p2217_p9)
}
 0xad6   : > { %s2221_s23 = scalar_lea.hbm %s2711_s27, 256  ;;  %s2225_s26 = scalar_lea.hbm %s2759_s3, 512 }
 0xad7   : > { %p2222_p13 = scmp.ne.s32.totalorder %s2711_s27, %s2221_s23  ;;  %p2226_p4 = scmp.lt.s32.totalorder %s2711_s27, %s2759_s3 }
 0xad8   : > { %p2227_p8 = scmp.lt.s32.totalorder %s2225_s26, %s2221_s23 }
 0xad9   : > { %p2223_p5 = pnand %p2222_p13, %p2775_p10 }
 0xada   : > { %p2228_p7 = por %p2227_p8, %p2226_p4 }
 0xadb   : > { %p2224_p0 = pneg %p2223_p5 }
 0xadd   : > { %p2229_p11 = pnand %p2228_p7, %p2224_p0 }
 0xadf   : > { %2232 = shalt.err (!%p2229_p11)
}
 0xae0   : > { %s2302_s30 = smov 128  }
 0xae1   : > { %2000 = dma.vmem_to_hbm [thread:$0]  (%p2775_p10), %s2705_s18, 256, %s2711_s27, %s1670_s29, %s2302_s30, %s2302_s30, %s2296_s22  }
 0xae2 PF: > { %s1698_s20 = sand.u32 1, %s2263_s12   ;;  %p2776_p1 = scmp.ne.s32.totalorder %s2765_s19, 0 }
 0xae3   : > { %p2777_p2 = scmp.ge.s32.totalorder %s2275_s15, 2  ;;  %s1699_s5 = scalar_lea.sflag [#allocation5], %s1698_s20 }
 0xae5   : > { %p2014_p6 = pnand %p2777_p2, %p2776_p1 }
 0xae7   : > { %p2015_p12 = pneg %p2014_p6 }
 0xae9   : > { %2258 = dma.done.wait (%p2015_p12), %s1699_s5, 256  }
 0xaea   : > { %2260 = vsyncadd (%p2015_p12), %s1699_s5, 4294967040  ;;  %p17_p3 = scmp.ge.s32.totalorder %s2398_s9, 4   ;;  %s2778_s12 = smov %s2267_s13 }
 0xaeb   : > { %s2779_s13 = smov %s2271_s14  ;;  %s2780_s14 = smov %s2407_s17 }
 0xaec   : > { %s2781_s15 = smov %s2398_s9  ;;  %19 = sbr.rel (!%p17_p3) target bundleno = 6 (0x6), region = 85 }
 0xaf1   :  { %1704 = vsyncpa [#allocation4], 1 }
 0xaf2   :  { %1706 = vsyncpa [#allocation4 + $0x1], 1 }
 0xaf3   :  { %1707 = vsyncpa [#allocation7], 1 }
 0xaf4   :  { %1708 = vsyncpa [#allocation5], 1 }
 0xaf5   :  { %1710 = vsyncpa [#allocation5 + $0x1], 1 }

</bundles_post_ra>
